<compile_context>
chip_gen: v7x
topology: tpu7x:2x2x1
jax: 0.10.0
libtpu: 0.0.40
codegen_flags: <defaults>
</compile_context>

<pallas_src>
import jax
import jax.numpy as jnp
from jax.experimental import pallas as pl
from jax.experimental.pallas import tpu as pltpu

H_DIM = 100   # StagerNet embedding size (matches nn.Linear(100, 1) head)
H_PAD = 128   # lane-aligned hidden size used inside the kernel (zero-padded)

TB_MAX = 512                    # target batch tile
TK_MAX = 512                    # target contraction tile
X_TILE_VMEM_BUDGET = 12 << 20   # bytes for the two double-buffered x tiles


def _round_up(n, m):
    return ((n + m - 1) // m) * m


def _cdiv(a, b):
    return (a + b - 1) // b


def _cpc_kernel(x1_ref, x2_ref, ws_ref, bs_ref, wl_ref, bl_ref, out_ref,
                acc1_ref, acc2_ref):
    # StagerNet feature extractor.
    # TODO(synk): StagerNet's class definition is not provided in the reference
    # file; a dense projection to h_dim=100 + ReLU stands in for it here.
    k = pl.program_id(1)

    @pl.when(k == 0)
    def _():
        acc1_ref[...] = jnp.zeros_like(acc1_ref)
        acc2_ref[...] = jnp.zeros_like(acc2_ref)

    # One weight K-tile, two dots (no in-kernel concat copy).  x tiles are
    # cast to bf16 here (VPU work hidden under the input DMA); accumulation
    # stays f32 in VMEM scratch.
    w = ws_ref[...]                                              # (tk, 128) bf16
    acc1_ref[...] += jnp.dot(x1_ref[...].astype(jnp.bfloat16), w,
                             preferred_element_type=jnp.float32)
    acc2_ref[...] += jnp.dot(x2_ref[...].astype(jnp.bfloat16), w,
                             preferred_element_type=jnp.float32)

    @pl.when(k == pl.num_programs(1) - 1)
    def _():
        h1 = jnp.maximum(acc1_ref[...] + bs_ref[...], 0.0)       # bias + ReLU
        h2 = jnp.maximum(acc2_ref[...] + bs_ref[...], 0.0)
        d = jnp.abs(h1 - h2)                                     # (TB, 128)
        # nn.Linear(100, 1): VPU multiply + XLU lane-reduce instead of an
        # N=1 MXU matmul.  Zero-padded hidden lanes contribute exactly 0.
        out_ref[...] = (jnp.sum(d * wl_ref[...], axis=-1, keepdims=True)
                        + bl_ref[0, 0])


def init_params(key, d_in):
    """Deterministic parameter init (PyTorch-style uniform bounds), H=100."""
    k1, k2, k3, k4 = jax.random.split(key, 4)
    bnd_s = 1.0 / jnp.sqrt(d_in)
    bnd_l = 1.0 / jnp.sqrt(H_DIM)
    ws = jax.random.uniform(k1, (d_in, H_DIM), jnp.float32, -bnd_s, bnd_s)
    bs = jax.random.uniform(k2, (1, H_DIM), jnp.float32, -bnd_s, bnd_s)
    wl = jax.random.uniform(k3, (H_DIM, 1), jnp.float32, -bnd_l, bnd_l)
    bl = jax.random.uniform(k4, (1, 1), jnp.float32, -bnd_l, bnd_l)
    return ws, bs, wl, bl


def prepare_params(params):
    """One-time weight prep (hidden pad 100 -> 128, ws cast to bf16).

    Done once at parameter-prep time so the pad/cast HBM pass does not recur
    on every forward call.  Numerically identical: padded hidden columns give
    ReLU(0 + 0) = 0 -> |0 - 0| = 0 -> weighted by 0 in wl.
    """
    ws, bs, wl, bl = params
    d_in = ws.shape[0]
    ws_b = jnp.zeros((d_in, H_PAD), jnp.bfloat16).at[:, :H_DIM].set(
        ws.astype(jnp.bfloat16))
    bs_p = jnp.zeros((1, H_PAD), jnp.float32).at[:, :H_DIM].set(
        bs.reshape(1, H_DIM))
    wl_p = jnp.zeros((1, H_PAD), jnp.float32).at[:, :H_DIM].set(
        wl.reshape(1, H_DIM))
    bl_p = bl.reshape(1, 1).astype(jnp.float32)
    return ws_b, bs_p, wl_p, bl_p


def _pick_tk(d):
    """Contraction tile: a multiple of 128 that divides D, else the full dim."""
    if d <= TK_MAX:
        return d
    for cand in (512, 256, 128):
        if d % cand == 0:
            return cand
    # TODO(synk): large D with no nice divisor falls back to an untiled
    # contraction; in-kernel tail masking would be needed to K-tile it
    # without re-introducing an input padding pass.
    return d


def _pick_tb(batch, tk):
    """Batch tile: large (amortize ~0.35us/step) but VMEM- and B-bounded."""
    tb = TB_MAX
    # two inputs x two pipeline buffers x (tb, tk) f32 tiles
    while tb > 8 and 2 * 2 * tb * tk * 4 > X_TILE_VMEM_BUDGET:
        tb //= 2
    if batch > 16:
        # keep >= 2 batch tiles so the "parallel" axis feeds both v7x cores
        tb = min(tb, _round_up(_cdiv(batch, 2), 8))
    else:
        tb = min(tb, _round_up(max(batch, 1), 8))
    return max(tb, 8)


def cpc_net_forward(Xc, Xp, Xb_array, prepared):
    # Xb_array, the Bilinear modules and LogSoftmax are unused in the
    # reference forward(), so they are accepted and ignored here as well.
    del Xb_array
    ws_b, bs_p, wl_p, bl_p = prepared

    B = Xc.shape[0]
    x1 = Xc.reshape(B, -1)      # upstream dtype preserved: no cast/pad passes
    x2 = Xp.reshape(B, -1)
    D = x1.shape[1]
    assert ws_b.shape[0] == D, (ws_b.shape, D)

    tk = _pick_tk(D)
    tb = _pick_tb(B, tk)
    grid = (_cdiv(B, tb), D // tk)   # batch (parallel) x contraction (arbitrary)

    wmap = lambda i, k: (0, 0)       # small params: same block -> VMEM-resident

    out = pl.pallas_call(
        _cpc_kernel,
        out_shape=jax.ShapeDtypeStruct((B, 1), jnp.float32),
        grid=grid,
        in_specs=[
            pl.BlockSpec((tb, tk), lambda i, k: (i, k)),        # Xc tile
            pl.BlockSpec((tb, tk), lambda i, k: (i, k)),        # Xp tile
            pl.BlockSpec((tk, H_PAD), lambda i, k: (k, 0)),     # ws K-tile (bf16)
            pl.BlockSpec((1, H_PAD), wmap),                     # bs (f32)
            pl.BlockSpec((1, H_PAD), wmap),                     # wl row (f32)
            pl.BlockSpec(memory_space=pltpu.MemorySpace.SMEM),  # bl scalar
        ],
        out_specs=pl.BlockSpec((tb, 1), lambda i, k: (i, 0)),
        scratch_shapes=[
            pltpu.VMEM((tb, H_PAD), jnp.float32),               # h1 accumulator
            pltpu.VMEM((tb, H_PAD), jnp.float32),               # h2 accumulator
        ],
        compiler_params=pltpu.CompilerParams(
            dimension_semantics=("parallel", "arbitrary"),      # megacore / 2-TC
            vmem_limit_bytes=48 << 20,                          # < v7x 64 MiB
        ),
    )(x1, x2, ws_b, bs_p, wl_p, bl_p)

    return out


def _reference(Xc, Xp, params):
    """Plain-JAX f32 reference (true module semantics) for a sanity check."""
    ws, bs, wl, bl = params
    B = Xc.shape[0]
    x1 = Xc.reshape(B, -1).astype(jnp.float32)
    x2 = Xp.reshape(B, -1).astype(jnp.float32)
    h1 = jnp.maximum(x1 @ ws + bs, 0.0)
    h2 = jnp.maximum(x2 @ ws + bs, 0.0)
    return jnp.abs(h1 - h2) @ wl + bl


if __name__ == "__main__":
    B, T, C = 2, 16, 4          # batch, time samples, EEG channels
    NP = 10                     # Np negatives (unused, matches __init__)

    key = jax.random.PRNGKey(0)
    kx, kp, kb, kw = jax.random.split(key, 4)
    Xc = jax.random.normal(kx, (B, T, C), jnp.float32)
    Xp = jax.random.normal(kp, (B, T, C), jnp.float32)
    Xb_array = jax.random.normal(kb, (NP, B, T, C), jnp.float32)  # unused in fwd

    params = init_params(kw, T * C)
    prepared = prepare_params(params)    # one-time weight pad/cast

    out = cpc_net_forward(Xc, Xp, Xb_array, prepared)
    out = jax.block_until_ready(out)

    ref = _reference(Xc, Xp, params)
    assert out.shape == (B, 1), out.shape
    # Loosened tolerance vs the f32 reference because the kernel matmul runs
    # in bf16 (f32 accumulation).
    assert jnp.allclose(out, ref, atol=3e-2, rtol=3e-2), (out, ref)

    print("KERNEL_OK")
</pallas_src>

<mosaic_0001>
module attributes {stable_mosaic.version = 11 : i64} {
  func.func @_cpc_kernel(%arg0: i32, %arg1: i32, %arg2: memref<8x64xf32, #tpu.memory_space<vmem>>, %arg3: memref<8x64xf32, #tpu.memory_space<vmem>>, %arg4: memref<64x128xbf16, #tpu.memory_space<vmem>>, %arg5: memref<1x128xf32, #tpu.memory_space<vmem>>, %arg6: memref<1x128xf32, #tpu.memory_space<vmem>>, %arg7: memref<1x1xf32, #tpu.memory_space<smem>>, %arg8: memref<8x1xf32, #tpu.memory_space<vmem>>, %arg9: memref<8x128xf32, #tpu.memory_space<vmem>>, %arg10: memref<8x128xf32, #tpu.memory_space<vmem>>) attributes {dimension_semantics = [#tpu.dimension_semantics<parallel>, #tpu.dimension_semantics<arbitrary>], iteration_bounds = array<i64: 1, 1>, scalar_prefetch = 0 : i64, scratch_operands = 2 : i64, tpu.core_type = #tpu.core_type<tc>, window_params = [{transform_indices = @transform_0, window_bounds = array<i64: 8, 64>}, {transform_indices = @transform_1, window_bounds = array<i64: 8, 64>}, {transform_indices = @transform_2, window_bounds = array<i64: 64, 128>}, {pipeline_mode = #tpu.pipeline_mode<synchronous>, transform_indices = @transform_3, window_bounds = array<i64: 1, 128>}, {pipeline_mode = #tpu.pipeline_mode<synchronous>, transform_indices = @transform_4, window_bounds = array<i64: 1, 128>}, {transform_indices = @transform_5, window_bounds = array<i64: 1, 1>}, {transform_indices = @transform_6, window_bounds = array<i64: 8, 1>}]} {
    %c0_i32 = arith.constant 0 : i32
    %0 = arith.cmpi eq, %arg1, %c0_i32 : i32
    %1 = arith.extui %0 : i1 to i32
    %c0_i32_0 = arith.constant 0 : i32
    %2 = arith.cmpi ne, %1, %c0_i32_0 : i32
    scf.if %2 {
      %cst_17 = arith.constant 0.000000e+00 : f32
      %19 = vector.broadcast %cst_17 : f32 to vector<8x128xf32>
      %c0_18 = arith.constant 0 : index
      %c0_19 = arith.constant 0 : index
      %20 = vector.load %arg9[%c0_18, %c0_19] : memref<8x128xf32, #tpu.memory_space<vmem>>, vector<8x128xf32>
      tpu.vector_store %arg9[%c0_18, %c0_19], %19 {strides = array<i32>} : memref<8x128xf32, #tpu.memory_space<vmem>>, vector<8x128xf32>,
      %cst_20 = arith.constant 0.000000e+00 : f32
      %21 = vector.broadcast %cst_20 : f32 to vector<8x128xf32>
      %c0_21 = arith.constant 0 : index
      %c0_22 = arith.constant 0 : index
      %22 = vector.load %arg10[%c0_21, %c0_22] : memref<8x128xf32, #tpu.memory_space<vmem>>, vector<8x128xf32>
      tpu.vector_store %arg10[%c0_21, %c0_22], %21 {strides = array<i32>} : memref<8x128xf32, #tpu.memory_space<vmem>>, vector<8x128xf32>,
    } else {
    }
    %c0 = arith.constant 0 : index
    %c0_1 = arith.constant 0 : index
    %3 = vector.load %arg4[%c0, %c0_1] : memref<64x128xbf16, #tpu.memory_space<vmem>>, vector<64x128xbf16>
    %c0_2 = arith.constant 0 : index
    %c0_3 = arith.constant 0 : index
    %4 = vector.load %arg9[%c0_2, %c0_3] : memref<8x128xf32, #tpu.memory_space<vmem>>, vector<8x128xf32>
    %c0_4 = arith.constant 0 : index
    %c0_5 = arith.constant 0 : index
    %5 = vector.load %arg2[%c0_4, %c0_5] : memref<8x64xf32, #tpu.memory_space<vmem>>, vector<8x64xf32>
    %6 = arith.truncf %5 : vector<8x64xf32> to vector<8x64xbf16>
    %cst = arith.constant dense<0.000000e+00> : vector<8x128xf32>
    %7 = tpu.matmul %6, %3, %cst {dimension_numbers = #tpu.dot_dimension_numbers<[1], [0], [0], [1], [0, 0, 1, 1], [], []>} : vector<8x64xbf16>, vector<64x128xbf16>, vector<8x128xf32> -> vector<8x128xf32>
    %8 = arith.addf %4, %7 : vector<8x128xf32>
    %c0_6 = arith.constant 0 : index
    %c0_7 = arith.constant 0 : index
    %9 = vector.load %arg9[%c0_6, %c0_7] : memref<8x128xf32, #tpu.memory_space<vmem>>, vector<8x128xf32>
    tpu.vector_store %arg9[%c0_6, %c0_7], %8 {strides = array<i32>} : memref<8x128xf32, #tpu.memory_space<vmem>>, vector<8x128xf32>,
    %c0_8 = arith.constant 0 : index
    %c0_9 = arith.constant 0 : index
    %10 = vector.load %arg10[%c0_8, %c0_9] : memref<8x128xf32, #tpu.memory_space<vmem>>, vector<8x128xf32>
    %c0_10 = arith.constant 0 : index
    %c0_11 = arith.constant 0 : index
    %11 = vector.load %arg3[%c0_10, %c0_11] : memref<8x64xf32, #tpu.memory_space<vmem>>, vector<8x64xf32>
    %12 = arith.truncf %11 : vector<8x64xf32> to vector<8x64xbf16>
    %cst_12 = arith.constant dense<0.000000e+00> : vector<8x128xf32>
    %13 = tpu.matmul %12, %3, %cst_12 {dimension_numbers = #tpu.dot_dimension_numbers<[1], [0], [0], [1], [0, 0, 1, 1], [], []>} : vector<8x64xbf16>, vector<64x128xbf16>, vector<8x128xf32> -> vector<8x128xf32>
    %14 = arith.addf %10, %13 : vector<8x128xf32>
    %c0_13 = arith.constant 0 : index
    %c0_14 = arith.constant 0 : index
    %15 = vector.load %arg10[%c0_13, %c0_14] : memref<8x128xf32, #tpu.memory_space<vmem>>, vector<8x128xf32>
    tpu.vector_store %arg10[%c0_13, %c0_14], %14 {strides = array<i32>} : memref<8x128xf32, #tpu.memory_space<vmem>>, vector<8x128xf32>,
    %c0_i32_15 = arith.constant 0 : i32
    %16 = arith.cmpi eq, %arg1, %c0_i32_15 : i32
    %17 = arith.extui %16 : i1 to i32
    %c0_i32_16 = arith.constant 0 : i32
    %18 = arith.cmpi ne, %17, %c0_i32_16 : i32
    scf.if %18 {
      %c0_17 = arith.constant 0 : index
      %c0_18 = arith.constant 0 : index
      %19 = vector.load %arg9[%c0_17, %c0_18] : memref<8x128xf32, #tpu.memory_space<vmem>>, vector<8x128xf32>
      %c0_19 = arith.constant 0 : index
      %c0_20 = arith.constant 0 : index
      %20 = vector.load %arg5[%c0_19, %c0_20] : memref<1x128xf32, #tpu.memory_space<vmem>>, vector<1x128xf32>
      %21 = vector.broadcast %20 : vector<1x128xf32> to vector<8x128xf32>
      %22 = arith.addf %19, %21 : vector<8x128xf32>
      %cst_21 = arith.constant 0.000000e+00 : f32
      %23 = vector.broadcast %cst_21 : f32 to vector<8x128xf32>
      %24 = arith.maximumf %22, %23 : vector<8x128xf32>
      %c0_22 = arith.constant 0 : index
      %c0_23 = arith.constant 0 : index
      %25 = vector.load %arg10[%c0_22, %c0_23] : memref<8x128xf32, #tpu.memory_space<vmem>>, vector<8x128xf32>
      %c0_24 = arith.constant 0 : index
      %c0_25 = arith.constant 0 : index
      %26 = vector.load %arg5[%c0_24, %c0_25] : memref<1x128xf32, #tpu.memory_space<vmem>>, vector<1x128xf32>
      %27 = vector.broadcast %26 : vector<1x128xf32> to vector<8x128xf32>
      %28 = arith.addf %25, %27 : vector<8x128xf32>
      %cst_26 = arith.constant 0.000000e+00 : f32
      %29 = vector.broadcast %cst_26 : f32 to vector<8x128xf32>
      %30 = arith.maximumf %28, %29 : vector<8x128xf32>
      %31 = arith.subf %24, %30 : vector<8x128xf32>
      %32 = math.absf %31 : vector<8x128xf32>
      %c0_27 = arith.constant 0 : index
      %c0_28 = arith.constant 0 : index
      %33 = vector.load %arg6[%c0_27, %c0_28] : memref<1x128xf32, #tpu.memory_space<vmem>>, vector<1x128xf32>
      %34 = vector.broadcast %33 : vector<1x128xf32> to vector<8x128xf32>
      %35 = arith.mulf %32, %34 : vector<8x128xf32>
      %cst_29 = arith.constant dense<0.000000e+00> : vector<8xf32>
      %36 = vector.multi_reduction <add>, %35, %cst_29 [1] : vector<8x128xf32> to vector<8xf32>
      %37 = vector.shape_cast %36 : vector<8xf32> to vector<8x1xf32>
      %c0_30 = arith.constant 0 : index
      %c0_31 = arith.constant 0 : index
      %38 = memref.load %arg7[%c0_30, %c0_31] : memref<1x1xf32, #tpu.memory_space<smem>>
      %39 = vector.broadcast %38 : f32 to vector<8x1xf32>
      %40 = arith.addf %37, %39 : vector<8x1xf32>
      %c0_32 = arith.constant 0 : index
      %c0_33 = arith.constant 0 : index
      %41 = vector.load %arg8[%c0_32, %c0_33] : memref<8x1xf32, #tpu.memory_space<vmem>>, vector<8x1xf32>
      tpu.vector_store %arg8[%c0_32, %c0_33], %40 {strides = array<i32>} : memref<8x1xf32, #tpu.memory_space<vmem>>, vector<8x1xf32>,
    } else {
    }
    return
  }
  func.func @transform_0(%arg0: i32, %arg1: i32) -> (i32, i32) {
    %c0_i32 = arith.constant 0 : i32
    return %arg0, %arg1 : i32, i32
  }
  func.func @transform_1(%arg0: i32, %arg1: i32) -> (i32, i32) {
    %c0_i32 = arith.constant 0 : i32
    return %arg0, %arg1 : i32, i32
  }
  func.func @transform_2(%arg0: i32, %arg1: i32) -> (i32, i32) {
    %c0_i32 = arith.constant 0 : i32
    %c0_i32_0 = arith.constant 0 : i32
    return %arg1, %c0_i32 : i32, i32
  }
  func.func @transform_3(%arg0: i32, %arg1: i32) -> (i32, i32) {
    %c0_i32 = arith.constant 0 : i32
    %c0_i32_0 = arith.constant 0 : i32
    %c0_i32_1 = arith.constant 0 : i32
    return %c0_i32, %c0_i32_0 : i32, i32
  }
  func.func @transform_4(%arg0: i32, %arg1: i32) -> (i32, i32) {
    %c0_i32 = arith.constant 0 : i32
    %c0_i32_0 = arith.constant 0 : i32
    %c0_i32_1 = arith.constant 0 : i32
    return %c0_i32, %c0_i32_0 : i32, i32
  }
  func.func @transform_5(%arg0: i32, %arg1: i32) -> (i32, i32) {
    %c0_i32 = arith.constant 0 : i32
    %c0_i32_0 = arith.constant 0 : i32
    %c0_i32_1 = arith.constant 0 : i32
    return %c0_i32, %c0_i32_0 : i32, i32
  }
  func.func @transform_6(%arg0: i32, %arg1: i32) -> (i32, i32) {
    %c0_i32 = arith.constant 0 : i32
    %c0_i32_0 = arith.constant 0 : i32
    return %arg0, %c0_i32 : i32, i32
  }
}

</mosaic_0001>

<bundles_post_ra>
// kernel: tpu_custom_call.1
= control target key start
LH: loop header
LB: loop body
LE: loop exit
PB: predicated region body
PF: predicated region fallthrough
CT: control target
= control target key end

     0   :  { %12 = vsyncpa [#allocation6], 0  ;;  %s322_s21 = smov [#allocation5]   ;;  %s392_s0 = inlined_call_operand.vmem [shape: f32[2,64], index: 0, kind: input, shape index: {}]   ;;  %s393_s1 = inlined_call_operand.vmem [shape: f32[2,64], index: 1, kind: input, shape index: {}]   ;;  %s394_s2 = inlined_call_operand.hbm [shape: bf16[64,128], index: 2, kind: input, shape index: {}]   ;;  %s395_s3 = inlined_call_operand.vmem [shape: f32[1,128], index: 3, kind: input, shape index: {}]   ;;  %s396_s4 = inlined_call_operand.vmem [shape: f32[1,128], index: 4, kind: input, shape index: {}]   ;;  %s397_s5 = inlined_call_operand.<no memory space> [shape: f32[1,1], index: 5, kind: input, shape index: {}]   ;;  %s398_s6 = inlined_call_operand.vmem [shape: f32[2,1], index: 6, kind: output, shape index: {}]  }
   0x1   :  { %s22_s22 = sshll.u32 %s322_s21, 4  ;;  %s298_s25 = scalar_lea.hbm %s394_s2, 512  ;;  %s23_s22 = int_to_ptr.vmem [resolvable:$true] %s22_s22 }
   0x2   :  { %p299_p0 = scmp.ne.s32.totalorder %s394_s2, %s298_s25  ;;  %p302_p1 = scmp.lt.u32.totalorder %s298_s25, %s394_s2 }
   0x4   :  { %p304_p2 = pnand %p302_p1, %p299_p0 }
   0x6   :  { %307 = shalt.err (!%p304_p2)
}
   0x7   :  { %s308_s30 = scalar_lea.vmem %s23_s22, 512  ;;  %p313_p4 = scmp.lt.s32.totalorder %s23_s22, %s23_s22 }
   0x8   :  { %p309_p3 = scmp.ne.s32.totalorder %s23_s22, %s308_s30  ;;  %p314_p5 = scmp.lt.s32.totalorder %s308_s30, %s308_s30 }
   0xa   :  { %p315_p6 = por %p314_p5, %p313_p4 }
   0xc   :  { %p316_p7 = pnand %p315_p6, %p309_p3 }
   0xe   :  { %319 = shalt.err (!%p316_p7)
}
   0xf   :  { %s323_s7 = smov 64   ;;  %s324_s8 = smov 4  }
  0x10   :  { %28 = dma.hbm_to_vmem [thread:$0]  %s394_s2, 512, %s23_s22, [#allocation6], %s323_s7, %s323_s7, %s324_s8  }
  0x11   :  { %320 = dma.done.wait [#allocation6], 512  }
  0x12   :  { %321 = vsyncadd [#allocation6], 4294966784  ;;  %v325_v0 = vmov 0.0   ;;  %vm326_vm0 = vmmov 0   ;;  %v294_v1 = vld [vmem:[#allocation5] sm:$0xff]   ;;  %v295_v2 = vld [vmem:[#allocation5 + $0x8] sm:$0xff]   ;;  %v203_v26 = vstv %s397_s5 }
  0x13   :  { %265 = vmatprep.subr.bf16.mxu0 %v325_v0  ;;  %277 = vmatprep.subr.bf16.mxu1 %v325_v0  ;;  %v296_v3 = vld [vmem:[#allocation5 + $0x10] sm:$0xff]   ;;  %v297_v4 = vld [vmem:[#allocation5 + $0x18] sm:$0xff]   ;;  %v54_v5 = vld [vmem:[%s392_s0] sm:$0xff]  ;;  %vm80_vm1 = vcmask 523264   ;;  %vm205_vm2 = vcmask 7168  }
  0x14   :  { %273 = vmatprep.mubr.msk.bf16.mxu0 %vm326_vm0, %v325_v0  ;;  %285 = vmatprep.mubr.msk.bf16.mxu1 %vm326_vm0, %v325_v0  ;;  %v127_v6 = vld [vmem:[%s393_s1] sm:$0xff]  ;;  %v55_v7 = vpack.c.bf16 %v54_v5, %v54_v5 }
  0x15   :  { %266 = vmatpush3.bf16.msra.mxu0 %v294_v1  ;;  %278 = vmatpush3.bf16.msra.mxu1 %v294_v1  ;;  %v128_v8 = vpack.c.bf16 %v127_v6, %v127_v6  ;;  %v253_v9 = vld [vmem:[%s395_s3] ss:$0 sm:$0xff] }
  0x16   :  { %267 = vmatprep.subr.bf16.mxu0 %v325_v0  ;;  %279 = vmatprep.subr.bf16.mxu1 %v325_v0  ;;  %v254_v23 = vld [vmem:[%s396_s4] ss:$0 sm:$0xff] }
  0x19   :  { %268 = vmatpush3.bf16.msra.mxu0 %v295_v2  ;;  %280 = vmatpush3.bf16.msra.mxu1 %v295_v2 }
  0x1a   :  { %269 = vmatprep.subr.bf16.mxu0 %v325_v0  ;;  %281 = vmatprep.subr.bf16.mxu1 %v325_v0 }
  0x1d   :  { %270 = vmatpush3.bf16.msra.mxu0 %v296_v3  ;;  %282 = vmatpush3.bf16.msra.mxu1 %v296_v3 }
  0x1e   :  { %271 = vmatprep.subr.bf16.mxu0 %v325_v0  ;;  %283 = vmatprep.subr.bf16.mxu1 %v325_v0 }
  0x21   :  { %272 = vmatpush3.bf16.msra.mxu0 %v297_v4  ;;  %284 = vmatpush3.bf16.msra.mxu1 %v297_v4 }
  0x24   :  { %274 = vmatmul.mubr.msk.bf16.vlgmr.msra.gmra.mrb[0].mxu0 %vm80_vm1, %v55_v7  ;;  %286 = vmatmul.mubr.msk.bf16.vlgmr.msra.gmra.mrb[0].mxu1 %vm80_vm1, %v128_v8 }
  0xf7   :  { %v118_v10 = vpop.f32.mrb[0].mxu0  ;;  %v166_v11 = vpop.f32.mrb[0].mxu1 }
  0xf8   :  { %v185_v12 = vadd.f32 %v253_v9, %v118_v10  ;;  %v188_v13 = vadd.f32 %v253_v9, %v166_v11  ;;  %v275_v14 = vpop.f32.mrb[1].mxu0  ;;  %v287_v15 = vpop.f32.mrb[1].mxu1 }
  0xf9   :  { %v121_v16 = vpop.f32.mrb[2].mxu0  ;;  %v169_v17 = vpop.f32.mrb[2].mxu1 }
  0xfa   :  { %v186_v18 = vmax.f32 %v185_v12, 0.0  ;;  %v189_v19 = vmax.f32 %v188_v13, 0.0  ;;  %v276_v20 = vpop.f32.mrb[3].mxu0  ;;  %v288_v21 = vpop.f32.mrb[3].mxu1 }
  0xfc   :  { %v190_v22 = vsub.f32 %v186_v18, %v189_v19 }
  0xfe   :  { %v191_v24 = vand.u32 2147483647, %v190_v22 }
 0x100   :  { %v199_v25 = vmul.f32 %v254_v23, %v191_v24 }
 0x102   :  { %200 = vadd.xlane.f32.xlu0 %v199_v25 }
 0x18f   :  { %v201_v27 = vpop.xlane.xlu0 %200 }
 0x190   :  { %v204_v28 = vadd.f32 %v203_v26, %v201_v27 }
 0x192   :  { %206 = vst.msk [vmem:[#allocation7] sm:$0xff] %vm205_vm2, %v204_v28 }
 0x199   :  { %v224_v29 = vld [vmem:[#allocation7] sm:$0x3] }
 0x19a   :  { %225 = vst [vmem:[%s398_s6] sm:$0x3] %v224_v29 }
 0x19b   :  { %242 = vsyncpa [#allocation6], 1 }

</bundles_post_ra>
